<compile_context>
chip_gen: v7x
topology: tpu7x:2x2x1
jax: 0.10.0
libtpu: 0.0.40
codegen_flags: <defaults>
</compile_context>

<pallas_src>
import functools

import jax
import jax.numpy as jnp
from jax.experimental import pallas as pl
from jax.experimental.pallas import tpu as pltpu


def _unshuffle_kernel(x_ref, o_ref, xt_ref, ct_ref, *, d, th, w, mode):
    # x_ref : (1, 1, th*d, W)  one channel-plane tile of the NCHW input (lanes = W)
    # o_ref : caffe   -> (1, d, d, 1, th, w)   block of output viewed as (N, d, d, C, h, w)
    #         pytorch -> (1, 1, d, d, th, w)   block of output viewed as (N, C, d, d, h, w)
    # xt_ref: (W, th*d) scratch — input tile transposed (width on sublanes)
    # ct_ref: (th*d, w) scratch — one width phase, lane-dense again (w on lanes)
    #
    # Strided selection is only cheap/expressible on the sublane axis, so we
    # transpose once, decimate sublanes, transpose back, then decimate sublanes
    # again for the row phase.  All stores are full (th, w) tiles.
    xt_ref[...] = jnp.swapaxes(x_ref[0, 0, :, :], 0, 1)          # (W, th*d)
    for dx in range(d):
        cols = xt_ref[pl.ds(dx, w, stride=d), :]                 # (w, th*d): width phase dx
        ct_ref[...] = jnp.swapaxes(cols, 0, 1)                   # (th*d, w), lanes = w
        for dy in range(d):
            tile = ct_ref[pl.ds(dy, th, stride=d), :]            # (th, w): height phase dy
            if mode == "caffe":
                o_ref[0, dy, dx, 0, :, :] = tile
            else:  # 'pytorch'
                o_ref[0, 0, dy, dx, :, :] = tile


def _pick_h_tile(h, d, W, itemsize, target_bytes=2 << 20):
    """Largest h tile (divisor of h, multiple of 8 if tiling) with a modest footprint."""
    if h * d * W * itemsize <= target_bytes:
        return h
    best = h  # fall back to whole plane (always correct)
    th = 8
    while th < h:
        if h % th == 0 and th * d * W * itemsize <= target_bytes:
            best = th
        th += 8
    return best


def pixel_unshuffle_align(x, downscale_factor: int = 2, mode: str = "caffe", h_tile=None):
    if x.ndim != 4:
        raise ValueError(f"input tensor shape {x.shape} is not supported.")
    if mode not in ("caffe", "pytorch"):
        raise NotImplementedError(f"{mode} mode is not implemented")

    N, C, H, W = x.shape
    d = int(downscale_factor)
    if d <= 0:
        raise ValueError("downscale_factor must be a positive integer")
    if H % d != 0 or W % d != 0:
        raise ValueError(f"H={H}, W={W} must be divisible by downscale_factor={d}")

    h, w = H // d, W // d
    c_out = C * d * d

    th = _pick_h_tile(h, d, W, x.dtype.itemsize) if h_tile is None else int(h_tile)
    if h % th != 0:
        raise ValueError(f"h_tile={th} must divide h={h}")
    nh = h // th
    TH = th * d

    if mode == "caffe":
        # out channel = (dy*d + dx)*C + c  ->  view output as (N, d, d, C, h, w)
        out_view_shape = (N, d, d, C, h, w)
        out_block = (1, d, d, 1, th, w)
        out_index = lambda n, c, ih: (n, 0, 0, c, ih, 0)
    else:
        # out channel = c*d*d + dy*d + dx  ->  view output as (N, C, d, d, h, w)
        out_view_shape = (N, C, d, d, h, w)
        out_block = (1, 1, d, d, th, w)
        out_index = lambda n, c, ih: (n, c, 0, 0, ih, 0)

    kernel = functools.partial(_unshuffle_kernel, d=d, th=th, w=w, mode=mode)

    out6 = pl.pallas_call(
        kernel,
        out_shape=jax.ShapeDtypeStruct(out_view_shape, x.dtype),
        grid=(N, C, nh),
        in_specs=[pl.BlockSpec((1, 1, TH, W), lambda n, c, ih: (n, c, ih, 0))],
        out_specs=pl.BlockSpec(out_block, out_index),
        scratch_shapes=[
            pltpu.VMEM((W, TH), x.dtype),   # transposed input tile
            pltpu.VMEM((TH, w), x.dtype),   # one width phase, lane-dense
        ],
        compiler_params=pltpu.CompilerParams(
            dimension_semantics=("parallel", "parallel", "parallel")),
    )(x)

    # Contiguous (free) reshape back to NCHW channel-flattened output.
    return out6.reshape(N, c_out, h, w)


def _reference(x, d=2, mode="caffe"):
    # Pure-jnp mirror of the PyTorch module, for verification only.
    N, C, H, W = x.shape
    h, w = H // d, W // d
    c = C * d * d
    xr = x.reshape(N, C, h, d, w, d)
    if mode == "caffe":
        xr = jnp.transpose(xr, (0, 3, 5, 1, 2, 4))
    else:
        xr = jnp.transpose(xr, (0, 1, 3, 5, 2, 4))
    return xr.reshape(N, c, h, w)


if __name__ == "__main__":
    key = jax.random.PRNGKey(0)
    x = jax.random.normal(key, (2, 4, 16, 16), dtype=jnp.float32)

    ok = True
    for mode in ("caffe", "pytorch"):
        out = pixel_unshuffle_align(x, downscale_factor=2, mode=mode)
        out = jax.block_until_ready(out)
        ref = _reference(x, d=2, mode=mode)
        if out.shape != ref.shape or out.dtype != ref.dtype:
            ok = False
        if not bool(jnp.array_equal(out, ref)):
            ok = False

    if ok:
        print("KERNEL_OK")
    else:
        raise SystemExit("mismatch vs reference")
</pallas_src>

<mosaic_0001>
module attributes {stable_mosaic.version = 11 : i64} {
  func.func @_unshuffle_kernel(%arg0: i32, %arg1: i32, %arg2: i32, %arg3: memref<1x1x16x16xf32, #tpu.memory_space<vmem>>, %arg4: memref<1x2x2x1x8x8xf32, #tpu.memory_space<vmem>>, %arg5: memref<16x16xf32, #tpu.memory_space<vmem>>, %arg6: memref<16x8xf32, #tpu.memory_space<vmem>>) attributes {dimension_semantics = [#tpu.dimension_semantics<parallel>, #tpu.dimension_semantics<parallel>, #tpu.dimension_semantics<parallel>], iteration_bounds = array<i64: 2, 4, 1>, scalar_prefetch = 0 : i64, scratch_operands = 2 : i64, tpu.core_type = #tpu.core_type<tc>, window_params = [{transform_indices = @transform_0, window_bounds = array<i64: 1, 1, 16, 16>}, {transform_indices = @transform_1, window_bounds = array<i64: 1, 2, 2, 1, 8, 8>}]} {
    %c0 = arith.constant 0 : index
    %c0_0 = arith.constant 0 : index
    %c0_1 = arith.constant 0 : index
    %c0_2 = arith.constant 0 : index
    %0 = vector.load %arg3[%c0, %c0_0, %c0_1, %c0_2] : memref<1x1x16x16xf32, #tpu.memory_space<vmem>>, vector<1x1x16x16xf32>
    %1 = vector.shape_cast %0 : vector<1x1x16x16xf32> to vector<16x16xf32>
    %2 = tpu.transpose %1, [1, 0] : vector<16x16xf32> -> vector<16x16xf32>
    %c0_3 = arith.constant 0 : index
    %c0_4 = arith.constant 0 : index
    %3 = vector.load %arg5[%c0_3, %c0_4] : memref<16x16xf32, #tpu.memory_space<vmem>>, vector<16x16xf32>
    tpu.vector_store %arg5[%c0_3, %c0_4], %2 {strides = array<i32>} : memref<16x16xf32, #tpu.memory_space<vmem>>, vector<16x16xf32>,
    %c0_5 = arith.constant 0 : index
    %c0_6 = arith.constant 0 : index
    %4 = tpu.strided_load %arg5[%c0_5, %c0_6] {strides = array<i32: 2, 1>} : memref<16x16xf32, #tpu.memory_space<vmem>>, vector<8x16xf32>
    %5 = tpu.transpose %4, [1, 0] : vector<8x16xf32> -> vector<16x8xf32>
    %c0_7 = arith.constant 0 : index
    %c0_8 = arith.constant 0 : index
    %6 = vector.load %arg6[%c0_7, %c0_8] : memref<16x8xf32, #tpu.memory_space<vmem>>, vector<16x8xf32>
    tpu.vector_store %arg6[%c0_7, %c0_8], %5 {strides = array<i32>} : memref<16x8xf32, #tpu.memory_space<vmem>>, vector<16x8xf32>,
    %c0_9 = arith.constant 0 : index
    %c0_10 = arith.constant 0 : index
    %7 = tpu.strided_load %arg6[%c0_9, %c0_10] {strides = array<i32: 2, 1>} : memref<16x8xf32, #tpu.memory_space<vmem>>, vector<8x8xf32>
    %c0_11 = arith.constant 0 : index
    %c0_12 = arith.constant 0 : index
    %c0_13 = arith.constant 0 : index
    %c0_14 = arith.constant 0 : index
    %c0_15 = arith.constant 0 : index
    %c0_16 = arith.constant 0 : index
    %8 = vector.load %arg4[%c0_11, %c0_12, %c0_13, %c0_14, %c0_15, %c0_16] : memref<1x2x2x1x8x8xf32, #tpu.memory_space<vmem>>, vector<1x1x1x1x8x8xf32>
    %9 = vector.shape_cast %8 : vector<1x1x1x1x8x8xf32> to vector<8x8xf32>
    %10 = vector.shape_cast %7 : vector<8x8xf32> to vector<1x1x1x1x8x8xf32>
    tpu.vector_store %arg4[%c0_11, %c0_12, %c0_13, %c0_14, %c0_15, %c0_16], %10 {strides = array<i32>} : memref<1x2x2x1x8x8xf32, #tpu.memory_space<vmem>>, vector<1x1x1x1x8x8xf32>,
    %c1 = arith.constant 1 : index
    %c0_17 = arith.constant 0 : index
    %11 = tpu.strided_load %arg6[%c1, %c0_17] {strides = array<i32: 2, 1>} : memref<16x8xf32, #tpu.memory_space<vmem>>, vector<8x8xf32>
    %c0_18 = arith.constant 0 : index
    %c1_19 = arith.constant 1 : index
    %c0_20 = arith.constant 0 : index
    %c0_21 = arith.constant 0 : index
    %c0_22 = arith.constant 0 : index
    %c0_23 = arith.constant 0 : index
    %12 = vector.load %arg4[%c0_18, %c1_19, %c0_20, %c0_21, %c0_22, %c0_23] : memref<1x2x2x1x8x8xf32, #tpu.memory_space<vmem>>, vector<1x1x1x1x8x8xf32>
    %13 = vector.shape_cast %12 : vector<1x1x1x1x8x8xf32> to vector<8x8xf32>
    %14 = vector.shape_cast %11 : vector<8x8xf32> to vector<1x1x1x1x8x8xf32>
    tpu.vector_store %arg4[%c0_18, %c1_19, %c0_20, %c0_21, %c0_22, %c0_23], %14 {strides = array<i32>} : memref<1x2x2x1x8x8xf32, #tpu.memory_space<vmem>>, vector<1x1x1x1x8x8xf32>,
    %c1_24 = arith.constant 1 : index
    %c0_25 = arith.constant 0 : index
    %15 = tpu.strided_load %arg5[%c1_24, %c0_25] {strides = array<i32: 2, 1>} : memref<16x16xf32, #tpu.memory_space<vmem>>, vector<8x16xf32>
    %16 = tpu.transpose %15, [1, 0] : vector<8x16xf32> -> vector<16x8xf32>
    %c0_26 = arith.constant 0 : index
    %c0_27 = arith.constant 0 : index
    %17 = vector.load %arg6[%c0_26, %c0_27] : memref<16x8xf32, #tpu.memory_space<vmem>>, vector<16x8xf32>
    tpu.vector_store %arg6[%c0_26, %c0_27], %16 {strides = array<i32>} : memref<16x8xf32, #tpu.memory_space<vmem>>, vector<16x8xf32>,
    %c0_28 = arith.constant 0 : index
    %c0_29 = arith.constant 0 : index
    %18 = tpu.strided_load %arg6[%c0_28, %c0_29] {strides = array<i32: 2, 1>} : memref<16x8xf32, #tpu.memory_space<vmem>>, vector<8x8xf32>
    %c0_30 = arith.constant 0 : index
    %c0_31 = arith.constant 0 : index
    %c1_32 = arith.constant 1 : index
    %c0_33 = arith.constant 0 : index
    %c0_34 = arith.constant 0 : index
    %c0_35 = arith.constant 0 : index
    %19 = vector.load %arg4[%c0_30, %c0_31, %c1_32, %c0_33, %c0_34, %c0_35] : memref<1x2x2x1x8x8xf32, #tpu.memory_space<vmem>>, vector<1x1x1x1x8x8xf32>
    %20 = vector.shape_cast %19 : vector<1x1x1x1x8x8xf32> to vector<8x8xf32>
    %21 = vector.shape_cast %18 : vector<8x8xf32> to vector<1x1x1x1x8x8xf32>
    tpu.vector_store %arg4[%c0_30, %c0_31, %c1_32, %c0_33, %c0_34, %c0_35], %21 {strides = array<i32>} : memref<1x2x2x1x8x8xf32, #tpu.memory_space<vmem>>, vector<1x1x1x1x8x8xf32>,
    %c1_36 = arith.constant 1 : index
    %c0_37 = arith.constant 0 : index
    %22 = tpu.strided_load %arg6[%c1_36, %c0_37] {strides = array<i32: 2, 1>} : memref<16x8xf32, #tpu.memory_space<vmem>>, vector<8x8xf32>
    %c0_38 = arith.constant 0 : index
    %c1_39 = arith.constant 1 : index
    %c1_40 = arith.constant 1 : index
    %c0_41 = arith.constant 0 : index
    %c0_42 = arith.constant 0 : index
    %c0_43 = arith.constant 0 : index
    %23 = vector.load %arg4[%c0_38, %c1_39, %c1_40, %c0_41, %c0_42, %c0_43] : memref<1x2x2x1x8x8xf32, #tpu.memory_space<vmem>>, vector<1x1x1x1x8x8xf32>
    %24 = vector.shape_cast %23 : vector<1x1x1x1x8x8xf32> to vector<8x8xf32>
    %25 = vector.shape_cast %22 : vector<8x8xf32> to vector<1x1x1x1x8x8xf32>
    tpu.vector_store %arg4[%c0_38, %c1_39, %c1_40, %c0_41, %c0_42, %c0_43], %25 {strides = array<i32>} : memref<1x2x2x1x8x8xf32, #tpu.memory_space<vmem>>, vector<1x1x1x1x8x8xf32>,
    return
  }
  func.func @transform_0(%arg0: i32, %arg1: i32, %arg2: i32) -> (i32, i32, i32, i32) {
    %c0_i32 = arith.constant 0 : i32
    %c0_i32_0 = arith.constant 0 : i32
    return %arg0, %arg1, %arg2, %c0_i32 : i32, i32, i32, i32
  }
  func.func @transform_1(%arg0: i32, %arg1: i32, %arg2: i32) -> (i32, i32, i32, i32, i32, i32) {
    %c0_i32 = arith.constant 0 : i32
    %c0_i32_0 = arith.constant 0 : i32
    %c0_i32_1 = arith.constant 0 : i32
    %c0_i32_2 = arith.constant 0 : i32
    return %arg0, %c0_i32, %c0_i32_0, %arg1, %arg2, %c0_i32_1 : i32, i32, i32, i32, i32, i32
  }
}

</mosaic_0001>

<bundles_post_ra>
// kernel: tpu_custom_call.1
= control target key start
LH: loop header
LB: loop body
LE: loop exit
PB: predicated region body
PF: predicated region fallthrough
CT: control target
= control target key end

     0   :  { %6 = vsyncpa [#allocation5], 0  ;;  %s853_s0 = inlined_call_operand.hbm [shape: f32[2,4,16,16], index: 0, kind: input, shape index: {}]   ;;  %s854_s1 = inlined_call_operand.hbm [shape: f32[2,2,2,4,8,8], index: 1, kind: output, shape index: {}]  }
   0x1   :  { %8 = vsyncpa [#allocation5 + $0x1], 0 }
   0x2   :  { %9 = vsyncpa [#allocation6], 0 }
   0x3   :  { %11 = vsyncpa [#allocation6 + $0x1], 0  ;;  %s649_s6 = smov 0   ;;  %s651_s7 = smov 0  }
   0x4   :  { %s653_s8 = smov 0   ;;  %s655_s9 = smov 0  }
   0x5   :  { %s657_s10 = smov 0   ;;  %s659_s11 = smov 0  }
   0x6   :  { %s661_s12 = smov 0   ;;  %s663_s13 = smov 0  }
   0x7 LB: > { %s399_s14 = sadd.s32 4294967295, %s630_s13   ;;  %s400_s15 = sadd.s32 4294967294, %s630_s13   ;;  %s630_s13 = sphi %s663_s13, %s17_s13   ;;  %s626_s12 = sphi %s661_s12, %s869_s12   ;;  %s622_s11 = sphi %s659_s11, %s868_s11   ;;  %s618_s10 = sphi %s657_s10, %s867_s10   ;;  %s614_s9 = sphi %s655_s9, %s866_s9   ;;  %s610_s8 = sphi %s653_s8, %s865_s8   ;;  %s606_s7 = sphi %s651_s7, %s864_s7   ;;  %s602_s6 = sphi %s649_s6, %s863_s6  }
   0x8   : > { %s32_s16 = sadd.s32 1, %s622_s11  ;;  %s36_s17 = sadd.s32 1, %s626_s12 }
   0x9   : > { %p34_p0 = scmp.ge.s32.totalorder %s32_s16, 4  ;;  %s47_s18 = sadd.s32 1, %s610_s8 }
   0xa   : > { %p54_p1 = scmp.ne.s32.totalorder %s610_s8, %s606_s7  ;;  %p55_p2 = scmp.eq.s32.totalorder %s630_s13, 0 }
   0xb   : > { %s871_s16 = smov (%p34_p0, %s32_s16), 0  ;;  %s873_s17 = smov (!%p34_p0, %s36_s17), %s626_s12 }
   0xc   : > { %s41_s19 = ssub.s32 %s622_s11, %s871_s16  ;;  %p702_p3 = por %p55_p2, %p54_p1 }
   0xd   : > { %p38_p4 = scmp.ge.s32.totalorder %s873_s17, 2  ;;  %p60_p5 = scmp.ne.s32.totalorder %s606_s7, %s602_s6 }
   0xe   : > { %p61_p6 = scmp.eq.s32.totalorder %s399_s14, 0  ;;  %p88_p7 = scmp.eq.s32.totalorder %s399_s14, 7 }
   0xf   : > { %s875_s17 = smov (%p38_p4, %s873_s17), 0  ;;  %p94_p10 = scmp.eq.s32.totalorder %s400_s15, 7 }
  0x10   : > { %p710_p8 = por %p61_p6, %p60_p5  ;;  %p714_p9 = por %p88_p7, %p54_p1 }
  0x11   : > { %s40_s23 = ssub.s32 %s626_s12, %s875_s17  ;;  %p720_p12 = por %p94_p10, %p60_p5 }
  0x12   : > { %s858_s22 = scalar_select %p714_p9, 1, 0 }
  0x13   : > { %s42_s24 = sor.u32 %s41_s19, %s40_s23  ;;  %p430_p13 = scmp.lt.s32.totalorder %s630_s13, 8 }
  0x14   : > { %p45_p11 = scmp.eq.s32.totalorder %s42_s24, 0  ;;  %s114_s26 = sand.u32 1, %s610_s8  }
  0x15   : > { %s859_s25 = scalar_select %p720_p12, 1, 0 }
  0x16   : > { %s727_s27 = scalar_select %p45_p11, %s610_s8, %s47_s18  }
  0x17   : > { %s403_s28 = sshll.u32 %s114_s26, 4  ;;  %s404_s29 = sshll.u32 %s622_s11, 1 }
  0x18   : > { %s405_s30 = sshll.u32 %s626_s12, 3  ;;  %s118_s2 = scalar_lea.vmem [#allocation4], %s403_s28 }
  0x19   : > { %s129_s3 = sshll.u32 %s118_s2, 4  ;;  %s126_s4 = sadd.s32 %s405_s30, %s404_s29  ;;  %s731_s3 = int_to_ptr.vmem [resolvable:$true] %s129_s3 }
  0x1a   : > { %s406_s5 = sshll.u32 %s126_s4, 7  ;;  %p735_p0 = pnand %p430_p13, %p702_p3 }
  0x1b   : > { %s742_s18 = scalar_lea.hbm %s853_s0, %s406_s5  ;;  %s744_s23 = scalar_lea.sflag [#allocation5], %s114_s26 }
  0x1c   : > { %s502_s24 = scalar_lea.hbm %s742_s18, 256  ;;  %p504_p2 = pneg %p735_p0 }
  0x1d   : > { %p503_p1 = scmp.ne.s32.totalorder %s742_s18, %s502_s24  ;;  %s507_s29 = scalar_lea.hbm %s853_s0, 2048 }
  0x1e   : > { %p508_p5 = scmp.lt.u32.totalorder %s742_s18, %s853_s0  ;;  %p509_p6 = scmp.lt.u32.totalorder %s507_s29, %s502_s24 }
  0x1f   : > { %p505_p3 = pnand %p504_p2, %p503_p1  ;;  %p511_p10 = scmp.lt.u32.totalorder %s502_s24, %s742_s18 }
  0x20   : > { %p510_p7 = por %p509_p6, %p508_p5 }
  0x21   : > { %p506_p4 = pneg %p505_p3 }
  0x22   : > { %p512_p11 = por %p511_p10, %p510_p7 }
  0x24   : > { %p513_p13 = pnand %p512_p11, %p506_p4 }
  0x26   : > { %516 = shalt.err (!%p513_p13)
}
  0x27   : > { %s517_s26 = scalar_lea.vmem %s731_s3, 256  ;;  %s632_s4 = smov [#allocation4]  }
  0x28   : > { %p518_p1 = scmp.ne.s32.totalorder %s731_s3, %s517_s26  ;;  %s522_s5 = sshll.u32 %s632_s4, 4  ;;  %s523_s5 = int_to_ptr.vmem [resolvable:$false] %s522_s5 }
  0x29   : > { %s524_s15 = scalar_lea.vmem %s523_s5, 512  ;;  %p525_p9 = scmp.lt.s32.totalorder %s731_s3, %s523_s5 }
  0x2a   : > { %p520_p3 = pnand %p518_p1, %p504_p2  ;;  %p526_p5 = scmp.lt.s32.totalorder %s524_s15, %s517_s26 }
  0x2c   : > { %p521_p12 = pneg %p520_p3  ;;  %p527_p6 = por %p526_p5, %p525_p9 }
  0x2e   : > { %p528_p7 = pnand %p527_p6, %p521_p12 }
  0x30   : > { %531 = shalt.err (!%p528_p7)
}
  0x31   : > { %s633_s19 = smov 128   ;;  %s634_s24 = smov 8  }
  0x32   : > { %425 = dma.hbm_to_vmem [thread:$0]  (!%p735_p0), %s742_s18, 256, %s731_s3, %s744_s23, %s633_s19, %s633_s19, %s634_s24  }
  0x33   : > { %p407_p2 = scmp.ge.s32.totalorder %s630_s13, 1  ;;  %p137_p4 = scmp.lt.s32.totalorder %s630_s13, 9 }
  0x35   : > { %p138_p10 = pnand %p407_p2, %p137_p4 }
  0x36   : > { %s775_s20 = sand.u32 (!%p138_p10), 1, %s606_s7  }
  0x37   : > { %141 = sbr.rel (%p138_p10) target bundleno = 371 (0x173), region = 24  ;;  %s408_s28 = sshll.u32 (!%p138_p10), %s775_s20, 4 }
  0x38   : > { %s144_s29 = scalar_lea.sflag (!%p138_p10), [#allocation5], %s775_s20  ;;  %s147_s30 = scalar_lea.vmem (!%p138_p10), [#allocation4], %s408_s28 }
  0x3e   : > { %593 = dma.done.wait (%p710_p8), %s144_s29, 256  }
  0x3f   : > { %595 = vsyncadd (%p710_p8), %s144_s29, 4294967040  ;;  %v167_v0 = vld [vmem:[%s147_s30] sm:$0xff]  ;;  %v168_v1 = vld [vmem:[%s147_s30 + $0x8] sm:$0xff]  ;;  %vm201_vm0 = vcmask 130048   ;;  %vm237_vm1 = vcmask 64512   ;;  %s409_s21 = sshll.u32 %s775_s20, 5 }
  0x40   : > { %169 = vxpose.xlu0.b32.start [1/2] (short) (narrow) %v167_v0, 16  ;;  %s414_s3 = sshll.u32 %s618_s10, 4  ;;  %s165_s18 = scalar_lea.vmem [#allocation7], %s409_s21 }
  0x41   : > { %s301_s14 = sadd.s32 %s614_s9, %s414_s3  ;;  %s304_s2 = sshll.u32 %s165_s18, 4  ;;  %s797_s2 = int_to_ptr.vmem [resolvable:$true] %s304_s2 }
  0x42   : > { %s415_s23 = sshll.u32 %s301_s14, 7  ;;  %s289_s10 = scalar_lea.sflag [#allocation6], %s775_s20 }
  0x43   : > { %s795_s9 = scalar_lea.hbm %s854_s1, %s415_s23  ;;  %s532_s5 = scalar_lea.vmem %s797_s2, 512 }
  0x44   : > { %170 = vxpose.xlu0.b32.end [2/2] (short) (narrow) %v168_v1, 16  ;;  %p533_p8 = scmp.ne.s32.totalorder %s797_s2, %s532_s5  ;;  %p861_p9 = scmp.ne.s32.totalorder %s858_s22, 0 }
  0x45   : > { %s635_s15 = smov [#allocation7]  }
  0x46   : > { %p534_p12 = pnand %p533_p8, %p861_p9  ;;  %s536_s19 = sshll.u32 %s635_s15, 4  ;;  %s537_s19 = int_to_ptr.vmem [resolvable:$false] %s536_s19 }
  0x47   : > { %s538_s24 = scalar_lea.vmem %s537_s19, 1024  ;;  %p539_p11 = scmp.lt.s32.totalorder %s797_s2, %s537_s19 }
  0x48   : > { %p535_p0 = pneg %p534_p12  ;;  %p540_p13 = scmp.lt.s32.totalorder %s538_s24, %s532_s5 }
  0x4a   : > { %p541_p1 = por %p540_p13, %p539_p11 }
  0x4c   : > { %p542_p3 = pnand %p541_p1, %p535_p0 }
  0xc0   : > { %v185_v2 = vpop.trf.xlu0 }
  0xc1   : > { %202 = vst.msk [vmem:[#allocation2] sm:$0xff] %vm201_vm0, %v185_v2 }
  0xc4   : > { %v186_v3 = vpop.trf.xlu0 }
  0xc5   : > { %203 = vst.msk [vmem:[#allocation2 + $0x8] sm:$0xff] %vm201_vm0, %v186_v3 }
  0xcc   : > { %v204_v4 = vld [vmem:[#allocation2] ss:$2 sm:$0xff]  ;;  %v247_v5 = vld [vmem:[#allocation2 + $0x1] ss:$2 sm:$0xff] }
  0xcd   : > { %205 = vxpose.xlu1.b32.start.end [1/1] (short) (narrow) %v204_v4, 16 }
  0xd2   : > { %248 = vxpose.xlu1.b32.start.end [1/1] (short) (narrow) %v247_v5, 16 }
 0x14d   : > { %v221_v6 = vpop.trf.xlu1 }
 0x14e   : > { %238 = vst.msk [vmem:[#allocation3] sm:$0xff] %vm237_vm1, %v221_v6 }
 0x151   : > { %v222_v7 = vpop.trf.xlu1 }
 0x152   : > { %239 = vst.msk [vmem:[#allocation3 + $0x8] sm:$0xff] %vm237_vm1, %v222_v7 }
 0x155   : > { %v264_v8 = vpop.trf.xlu1 }
 0x159   : > { %v240_v9 = vld [vmem:[#allocation3] ss:$2 sm:$0xff]  ;;  %v243_v10 = vld [vmem:[#allocation3 + $0x1] ss:$2 sm:$0xff]  ;;  %v265_v11 = vpop.trf.xlu1 }
 0x15a   : > { %241 = vst.msk [vmem:[%s165_s18] sm:$0xff] %vm237_vm1, %v240_v9  ;;  %410 = vst.msk [vmem:[%s165_s18 + $0x10] sm:$0xff] %vm237_vm1, %v243_v10 }
 0x15b   : > { %280 = vst.msk [vmem:[#allocation3] sm:$0xff] %vm237_vm1, %v264_v8  ;;  %281 = vst.msk [vmem:[#allocation3 + $0x8] sm:$0xff] %vm237_vm1, %v265_v11 }
 0x162   : > { %v282_v12 = vld [vmem:[#allocation3] ss:$2 sm:$0xff]  ;;  %v285_v13 = vld [vmem:[#allocation3 + $0x1] ss:$2 sm:$0xff] }
 0x163   : > { %411 = vst.msk [vmem:[%s165_s18 + $0x8] sm:$0xff] %vm237_vm1, %v282_v12  ;;  %412 = vst.msk [vmem:[%s165_s18 + $0x18] sm:$0xff] %vm237_vm1, %v285_v13 }
 0x164   : > { %545 = shalt.err (!%p542_p3)
}
 0x165   : > { %s546_s28 = scalar_lea.hbm %s795_s9, 512  ;;  %s550_s21 = scalar_lea.hbm %s854_s1, 4096 }
 0x166   : > { %p547_p5 = scmp.ne.s32.totalorder %s795_s9, %s546_s28  ;;  %p551_p2 = scmp.lt.u32.totalorder %s795_s9, %s854_s1 }
 0x167   : > { %p552_p4 = scmp.lt.u32.totalorder %s550_s21, %s546_s28  ;;  %p554_p8 = scmp.lt.u32.totalorder %s546_s28, %s795_s9 }
 0x168   : > { %p548_p6 = pnand %p547_p5, %p861_p9 }
 0x169   : > { %p553_p10 = por %p552_p4, %p551_p2 }
 0x16a   : > { %p549_p7 = pneg %p548_p6 }
 0x16b   : > { %p555_p12 = por %p554_p8, %p553_p10 }
 0x16d   : > { %p556_p0 = pnand %p555_p12, %p549_p7 }
 0x16f   : > { %559 = shalt.err (!%p556_p0)
}
 0x170   : > { %s636_s18 = smov 128   ;;  %s637_s23 = smov 512  }
 0x171   : > { %s638_s26 = smov 8  }
 0x172   : > { %420 = dma.vmem_to_hbm [thread:$0]  (%p861_p9), %s797_s2, 512, %s795_s9, %s289_s10, %s636_s18, %s637_s23, %s638_s26  }
 0x173 PF: > { %p431_p11 = scmp.ge.s32.totalorder %s630_s13, 2  ;;  %s319_s4 = sand.u32 1, %s602_s6  }
 0x174   : > { %p862_p13 = scmp.ne.s32.totalorder %s859_s25, 0  ;;  %s320_s5 = scalar_lea.sflag [#allocation6], %s319_s4 }
 0x176   : > { %p427_p1 = pnand %p431_p11, %p862_p13 }
 0x178   : > { %597 = dma.done.wait (!%p427_p1), %s320_s5, 512  }
 0x179   : > { %599 = vsyncadd (!%p427_p1), %s320_s5, 4294966784  ;;  %s17_s13 = sadd.s32 1, %s630_s13   ;;  %s863_s6 = smov %s606_s7 }
 0x17a   : > { %p14_p3 = scmp.ge.s32.totalorder %s17_s13, 10   ;;  %s864_s7 = smov %s610_s8 }
 0x17b   : > { %s865_s8 = smov %s727_s27  ;;  %s866_s9 = smov %s622_s11 }
 0x17c   : > { %s867_s10 = smov %s626_s12  ;;  %s868_s11 = smov %s871_s16 }
 0x17d   : > { %s869_s12 = smov %s875_s17  ;;  %16 = sbr.rel (!%p14_p3) target bundleno = 7 (0x7), region = 74 }
 0x184   :  { %325 = vsyncpa [#allocation5], 1 }
 0x185   :  { %327 = vsyncpa [#allocation5 + $0x1], 1 }
 0x186   :  { %328 = vsyncpa [#allocation6], 1 }
 0x187   :  { %330 = vsyncpa [#allocation6 + $0x1], 1 }

</bundles_post_ra>
